<compile_context>
chip_gen: v6e
topology: v6e:2x2x1
jax: 0.10.0
libtpu: 0.0.40
codegen_flags: <defaults>
</compile_context>

<pallas_src>
import math

import jax
import jax.numpy as jnp
from jax.experimental import pallas as pl
from jax.experimental.pallas import tpu as pltpu

_LANES = 128


def _round_up(v, m):
    return ((v + m - 1) // m) * m


def _tile_budget():
    """Per-chip tile sizing: bigger tiles amortize the ~0.35us/grid-step cost.

    v7x (64 MiB VMEM, 32 MiB scoped): 8192-row f32 tiles -> 2 inputs x 2 bufs
    x 4 MiB = 16 MiB, comfortably under the 32 MiB scoped limit.
    v5e/v6e (128 MiB VMEM): 16384-row tiles with an 80 MiB scoped limit.
    """
    try:
        info = pltpu.get_tpu_info()
        if info.vmem_capacity_bytes >= 100 * 1024 * 1024:
            return 16384, 80 * 1024 * 1024
    except Exception:
        pass
    return 8192, 32 * 1024 * 1024


# ----------------------------------------------------------------------------
# Pallas kernel: fused BCE-with-logits + dice-loss partial sums
# ----------------------------------------------------------------------------
def _make_loss_kernel(n_valid, rows_tile, kpg):
    """Kernel for one (batch, split, k-tile) grid point.

    Accumulates lane-dense (3, 128) partial sums per (batch, split):
      row 0: bce terms, row 1: s*z, row 2: s+z (dice denominator).
    """

    def kernel(pred_ref, mask_ref, out_ref):
        g = pl.program_id(1)
        k = pl.program_id(2)

        @pl.when(k == 0)
        def _init():
            out_ref[...] = jnp.zeros_like(out_ref)

        x = pred_ref[...].astype(jnp.float32)   # (rows_tile, 128) logits
        z = mask_ref[...].astype(jnp.float32)   # (rows_tile, 128) binary targets

        # One transcendental pass: e = exp(-|x|) drives both the stable BCE and
        # the sigmoid.  The divide goes to the EUP via approx reciprocal.
        e = jnp.exp(-jnp.abs(x))
        log1pe = jnp.log1p(e)
        inv_1pe = pl.reciprocal(1.0 + e, approx=True)

        # Numerically-stable BCE-with-logits: max(x,0) - x*z + log1p(exp(-|x|)).
        bce = jnp.maximum(x, 0.0) - x * z + log1pe

        # sigmoid(x) = 1/(1+e) for x>=0, e/(1+e) for x<0; then torch-style clamp.
        s = jnp.where(x >= 0.0, inv_1pe, e * inv_1pe)
        s = jnp.clip(s, 0.0001, 1.0 - 0.0001)

        kg = g * kpg + k                         # global reduction-block index
        block_start = kg * (rows_tile * _LANES)
        block_end = block_start + rows_tile * _LANES

        @pl.when(block_end <= n_valid)
        def _full_tile():
            # Fast path (vast majority of tiles): no per-element validity math.
            out_ref[0:1, :] += jnp.sum(bce, axis=0, keepdims=True)
            out_ref[1:2, :] += jnp.sum(s * z, axis=0, keepdims=True)
            out_ref[2:3, :] += jnp.sum(s + z, axis=0, keepdims=True)

        @pl.when(block_end > n_valid)
        def _ragged_tile():
            # Trailing tile(s) only: mask lane-pad zeros and undefined rows.
            row = jax.lax.broadcasted_iota(jnp.int32, (rows_tile, _LANES), 0)
            lane = jax.lax.broadcasted_iota(jnp.int32, (rows_tile, _LANES), 1)
            valid = (block_start + row * _LANES + lane) < n_valid
            out_ref[0:1, :] += jnp.sum(jnp.where(valid, bce, 0.0), axis=0, keepdims=True)
            out_ref[1:2, :] += jnp.sum(jnp.where(valid, s * z, 0.0), axis=0, keepdims=True)
            out_ref[2:3, :] += jnp.sum(jnp.where(valid, s + z, 0.0), axis=0, keepdims=True)

    return kernel


def _aiu_loss_pallas(pred, mask):
    """Fused BCE-with-logits + dice loss over (B, C, H, W) prediction / mask.

    Inputs are streamed in their native dtypes and cast inside the kernel.
    Returns the scalar training loss (matches the PyTorch reference).
    """
    b = pred.shape[0]
    n = math.prod(pred.shape[1:])
    rows = pl.cdiv(n, _LANES)
    n_lane = rows * _LANES

    # Flatten to a lane-dense (b, rows, 128) slab. The reshape is free when the
    # flattened image is already 128-aligned (typical H*W sizes).
    # TODO(synk): when n % 128 != 0 the pad is an unavoidable HBM round trip.
    def to_slab(a):
        a2 = a.reshape(b, n)
        if n_lane != n:
            a2 = jnp.pad(a2, ((0, 0), (0, n_lane - n)))
        return a2.reshape(b, rows, _LANES)

    pred3 = to_slab(pred)
    mask3 = to_slab(mask)

    max_rows, vmem_limit = _tile_budget()

    # Split the reduction into 2 parallel chunks when the batch is tiny so a
    # dual-TensorCore chip (v7x) keeps both cores busy; "parallel" is measured
    # neutral on single-core v5e/v6e, so this is safe everywhere.
    g_split = 2 if b == 1 else 1

    # Balanced tiling: pick the chunk count first, then a 32-row-aligned tile
    # size that never exceeds the slab, so only trailing tiles are ragged.
    k_target = _round_up(max(pl.cdiv(rows, max_rows), g_split), g_split)
    rows_tile = _round_up(pl.cdiv(rows, k_target), 32)
    if rows_tile > rows:
        # Tiny input: keep the block inside the array (sublane-aligned, or the
        # full dim when rows < 8 -- both are legal block shapes).
        rows_tile = rows if rows < 8 else (rows // 8) * 8
    n_blocks = pl.cdiv(rows, rows_tile)            # blocks that touch real data
    k_steps = _round_up(max(n_blocks, g_split), g_split)
    kpg = k_steps // g_split

    if k_steps == n_blocks:
        def in_map(i, g, k):
            return (i, g * kpg + k, 0)
    else:
        # g-split rounding added empty trailing blocks: clamp their DMA to the
        # last real block; the in-kernel mask zeroes their contribution.
        def in_map(i, g, k):
            return (i, jnp.minimum(g * kpg + k, n_blocks - 1), 0)

    bytes_in = (pred3.size * pred3.dtype.itemsize
                + mask3.size * mask3.dtype.itemsize)
    cost = pl.CostEstimate(
        flops=18 * b * n_lane,
        transcendentals=3 * b * n_lane,
        bytes_accessed=bytes_in + b * g_split * 3 * _LANES * 4,
    )

    partials = pl.pallas_call(
        _make_loss_kernel(n, rows_tile, kpg),
        out_shape=jax.ShapeDtypeStruct((b, g_split, 3, _LANES), jnp.float32),
        grid_spec=pltpu.PrefetchScalarGridSpec(
            num_scalar_prefetch=0,
            grid=(b, g_split, kpg),
            in_specs=[
                pl.BlockSpec((None, rows_tile, _LANES), in_map),
                pl.BlockSpec((None, rows_tile, _LANES), in_map),
            ],
            out_specs=pl.BlockSpec((None, None, 3, _LANES),
                                   lambda i, g, k: (i, g, 0, 0)),
        ),
        compiler_params=pltpu.CompilerParams(
            dimension_semantics=("parallel", "parallel", "arbitrary"),
            vmem_limit_bytes=vmem_limit,
        ),
        cost_estimate=cost,
    )(pred3, mask3)

    # Tiny final reduction in plain JAX: (b, g, 3, 128) -> scalars.
    sums = jnp.sum(partials, axis=(1, 3))           # (b, 3): bce, s*z, s+z
    bce_mean = jnp.sum(sums[:, 0]) / (b * n)
    dice_mean = jnp.mean(1.0 - (2.0 * sums[:, 1] + 1.0) / (sums[:, 2] + 1.0))
    return bce_mean + dice_mean


# ----------------------------------------------------------------------------
# AIUnet forward (training branch), Pallas-backed where the math is defined.
# ----------------------------------------------------------------------------
@jax.jit
def aiunet_forward_training(pred_logits_nchw, mask_nchw):
    """Training-branch forward: returns (pred, mask, loss) exactly like
    AIUnet.forward when self.training is True.

    # TODO(synk): `pred_logits_nchw` stands for the post-defuse logits; the
    # CLIP/FPN3/u2net/Projector/Fuse_atten pipeline is not provided in source.
    """
    loss = _aiu_loss_pallas(pred_logits_nchw, mask_nchw)
    return pred_logits_nchw, mask_nchw, loss


# ----------------------------------------------------------------------------
# Pure-JAX reference (mirrors the PyTorch _sigmoid / dice_loss / BCE semantics)
# ----------------------------------------------------------------------------
def _reference_loss(pred_nchw, mask_nchw):
    x = pred_nchw.astype(jnp.float32)
    z = mask_nchw.astype(jnp.float32)
    bce = jnp.mean(jnp.maximum(x, 0.0) - x * z + jnp.log1p(jnp.exp(-jnp.abs(x))))
    b = x.shape[0]
    s = jnp.clip(jax.nn.sigmoid(x), 0.0001, 1.0 - 0.0001).reshape(b, -1)
    t = z.reshape(b, -1)
    num = 2.0 * jnp.sum(s * t, axis=1)
    den = jnp.sum(s, axis=1) + jnp.sum(t, axis=1)
    dice = jnp.mean(1.0 - (num + 1.0) / (den + 1.0))
    return bce + dice


if __name__ == "__main__":
    key = jax.random.PRNGKey(0)
    k_pred, k_mask, k_pred2, k_mask2 = jax.random.split(key, 4)

    # Tolerance slightly loosened vs exact f32: approx reciprocal (EUP vrcp)
    # shifts the clamped sigmoid / dice by ~1e-4 relative.
    TOL = 5e-3

    B, C, H, W = 2, 1, 64, 64   # post-defuse prediction matches mask: (b, 1, h, w)
    pred_logits = jax.random.normal(k_pred, (B, C, H, W), dtype=jnp.float32)
    mask = (jax.random.uniform(k_mask, (B, C, H, W)) > 0.5).astype(jnp.float32)

    # float32 path
    pred_out, mask_out, loss = aiunet_forward_training(pred_logits, mask)
    jax.block_until_ready(loss)
    ref = _reference_loss(pred_logits, mask)
    assert jnp.allclose(loss, ref, rtol=TOL, atol=TOL), (loss, ref)
    assert pred_out.shape == (B, C, H, W) and mask_out.shape == (B, C, H, W)

    # native low-precision path: bf16 logits + int8 mask streamed without any
    # wrapper-side upcast (HBM-traffic win on v5e/v6e).
    pred_bf16 = pred_logits.astype(jnp.bfloat16)
    mask_i8 = mask.astype(jnp.int8)
    _, _, loss_lp = aiunet_forward_training(pred_bf16, mask_i8)
    jax.block_until_ready(loss_lp)
    ref_lp = _reference_loss(pred_bf16.astype(jnp.float32), mask)
    assert jnp.allclose(loss_lp, ref_lp, rtol=TOL, atol=TOL), (loss_lp, ref_lp)

    # ragged path: H*W not 128-aligned -> lane pad + masked trailing tile.
    Hr = Wr = 63
    pred_r = jax.random.normal(k_pred2, (B, C, Hr, Wr), dtype=jnp.float32)
    mask_r = (jax.random.uniform(k_mask2, (B, C, Hr, Wr)) > 0.5).astype(jnp.float32)
    _, _, loss_r = aiunet_forward_training(pred_r, mask_r)
    jax.block_until_ready(loss_r)
    ref_r = _reference_loss(pred_r, mask_r)
    assert jnp.allclose(loss_r, ref_r, rtol=TOL, atol=TOL), (loss_r, ref_r)

    # batch=1: exercises the 2-way reduction split (dual-TensorCore path on v7x).
    _, _, loss_b1 = aiunet_forward_training(pred_logits[:1], mask[:1])
    jax.block_until_ready(loss_b1)
    ref_b1 = _reference_loss(pred_logits[:1], mask[:1])
    assert jnp.allclose(loss_b1, ref_b1, rtol=TOL, atol=TOL), (loss_b1, ref_b1)

    print("KERNEL_OK")
</pallas_src>

<mosaic_0001>
module attributes {stable_mosaic.version = 11 : i64} {
  func.func @kernel(%arg0: i32, %arg1: i32, %arg2: i32, %arg3: memref<1x32x128xf32, #tpu.memory_space<vmem>>, %arg4: memref<1x32x128xf32, #tpu.memory_space<vmem>>, %arg5: memref<1x1x3x128xf32, #tpu.memory_space<vmem>>) attributes {dimension_semantics = [#tpu.dimension_semantics<parallel>, #tpu.dimension_semantics<parallel>, #tpu.dimension_semantics<arbitrary>], iteration_bounds = array<i64: 2, 1, 1>, scalar_prefetch = 0 : i64, scratch_operands = 0 : i64, tpu.core_type = #tpu.core_type<tc>, window_params = [{transform_indices = @transform_0, window_bounds = array<i64: 1, 32, 128>}, {transform_indices = @transform_1, window_bounds = array<i64: 1, 32, 128>}, {transform_indices = @transform_2, window_bounds = array<i64: 1, 1, 3, 128>}]} {
    %c0_i32 = arith.constant 0 : i32
    %0 = arith.cmpi eq, %arg2, %c0_i32 : i32
    %1 = arith.extui %0 : i1 to i32
    %c0_i32_0 = arith.constant 0 : i32
    %2 = arith.cmpi ne, %1, %c0_i32_0 : i32
    scf.if %2 {
      %cst_16 = arith.constant 0.000000e+00 : f32
      %38 = vector.broadcast %cst_16 : f32 to vector<3x128xf32>
      %c0_17 = arith.constant 0 : index
      %c0_18 = arith.constant 0 : index
      %c0_19 = arith.constant 0 : index
      %c0_20 = arith.constant 0 : index
      %39 = vector.load %arg5[%c0_17, %c0_18, %c0_19, %c0_20] : memref<1x1x3x128xf32, #tpu.memory_space<vmem>>, vector<1x1x3x128xf32>
      %40 = vector.shape_cast %39 : vector<1x1x3x128xf32> to vector<3x128xf32>
      %41 = vector.shape_cast %38 : vector<3x128xf32> to vector<1x1x3x128xf32>
      tpu.vector_store %arg5[%c0_17, %c0_18, %c0_19, %c0_20], %41 {strides = array<i32>} : memref<1x1x3x128xf32, #tpu.memory_space<vmem>>, vector<1x1x3x128xf32>,
    } else {
    }
    %c0 = arith.constant 0 : index
    %c0_1 = arith.constant 0 : index
    %c0_2 = arith.constant 0 : index
    %3 = vector.load %arg3[%c0, %c0_1, %c0_2] : memref<1x32x128xf32, #tpu.memory_space<vmem>>, vector<1x32x128xf32>
    %4 = vector.shape_cast %3 : vector<1x32x128xf32> to vector<32x128xf32>
    %c0_3 = arith.constant 0 : index
    %c0_4 = arith.constant 0 : index
    %c0_5 = arith.constant 0 : index
    %5 = vector.load %arg4[%c0_3, %c0_4, %c0_5] : memref<1x32x128xf32, #tpu.memory_space<vmem>>, vector<1x32x128xf32>
    %6 = vector.shape_cast %5 : vector<1x32x128xf32> to vector<32x128xf32>
    %7 = math.absf %4 : vector<32x128xf32>
    %cst = arith.constant 0.000000e+00 : f32
    %8 = vector.broadcast %cst : f32 to vector<32x128xf32>
    %9 = arith.subf %8, %7 : vector<32x128xf32>
    %10 = math.exp %9 : vector<32x128xf32>
    %11 = math.log1p %10 : vector<32x128xf32>
    %cst_6 = arith.constant 1.000000e+00 : f32
    %12 = vector.broadcast %cst_6 : f32 to vector<32x128xf32>
    %13 = arith.addf %12, %10 : vector<32x128xf32>
    %14 = tpu.reciprocal %13 {approx = true} : vector<32x128xf32> -> vector<32x128xf32>
    %cst_7 = arith.constant 0.000000e+00 : f32
    %15 = vector.broadcast %cst_7 : f32 to vector<32x128xf32>
    %16 = arith.maximumf %4, %15 : vector<32x128xf32>
    %17 = arith.mulf %4, %6 : vector<32x128xf32>
    %18 = arith.subf %16, %17 : vector<32x128xf32>
    %19 = arith.addf %18, %11 : vector<32x128xf32>
    %cst_8 = arith.constant 0.000000e+00 : f32
    %20 = vector.broadcast %cst_8 : f32 to vector<32x128xf32>
    %21 = arith.cmpf oge, %4, %20 : vector<32x128xf32>
    %22 = arith.mulf %10, %14 : vector<32x128xf32>
    %23 = arith.select %21, %14, %22 : vector<32x128xi1>, vector<32x128xf32>
    %cst_9 = arith.constant 9.99999974E-5 : f32
    %cst_10 = arith.constant 0.999899983 : f32
    %24 = vector.broadcast %cst_9 : f32 to vector<32x128xf32>
    %25 = arith.maximumf %24, %23 : vector<32x128xf32>
    %26 = vector.broadcast %cst_10 : f32 to vector<32x128xf32>
    %27 = arith.minimumf %26, %25 : vector<32x128xf32>
    %c1_i32 = arith.constant 1 : i32
    %28 = arith.muli %arg1, %c1_i32 : i32
    %29 = arith.addi %28, %arg2 : i32
    %c4096_i32 = arith.constant 4096 : i32
    %30 = arith.muli %29, %c4096_i32 : i32
    %c4096_i32_11 = arith.constant 4096 : i32
    %31 = arith.addi %30, %c4096_i32_11 : i32
    %c4096_i32_12 = arith.constant 4096 : i32
    %32 = arith.cmpi sle, %31, %c4096_i32_12 : i32
    %33 = arith.extui %32 : i1 to i32
    %c0_i32_13 = arith.constant 0 : i32
    %34 = arith.cmpi ne, %33, %c0_i32_13 : i32
    scf.if %34 {
      %c0_16 = arith.constant 0 : index
      %c0_17 = arith.constant 0 : index
      %c0_18 = arith.constant 0 : index
      %c0_19 = arith.constant 0 : index
      %38 = vector.load %arg5[%c0_16, %c0_17, %c0_18, %c0_19] : memref<1x1x3x128xf32, #tpu.memory_space<vmem>>, vector<1x1x1x128xf32>
      %39 = vector.shape_cast %38 : vector<1x1x1x128xf32> to vector<1x128xf32>
      %cst_20 = arith.constant dense<0.000000e+00> : vector<128xf32>
      %40 = vector.multi_reduction <add>, %19, %cst_20 [0] : vector<32x128xf32> to vector<128xf32>
      %41 = vector.shape_cast %40 : vector<128xf32> to vector<1x128xf32>
      %42 = arith.addf %39, %41 : vector<1x128xf32>
      %c0_21 = arith.constant 0 : index
      %c0_22 = arith.constant 0 : index
      %c0_23 = arith.constant 0 : index
      %c0_24 = arith.constant 0 : index
      %43 = vector.load %arg5[%c0_21, %c0_22, %c0_23, %c0_24] : memref<1x1x3x128xf32, #tpu.memory_space<vmem>>, vector<1x1x1x128xf32>
      %44 = vector.shape_cast %43 : vector<1x1x1x128xf32> to vector<1x128xf32>
      %45 = vector.shape_cast %42 : vector<1x128xf32> to vector<1x1x1x128xf32>
      tpu.vector_store %arg5[%c0_21, %c0_22, %c0_23, %c0_24], %45 {strides = array<i32>} : memref<1x1x3x128xf32, #tpu.memory_space<vmem>>, vector<1x1x1x128xf32>,
      %c0_25 = arith.constant 0 : index
      %c0_26 = arith.constant 0 : index
      %c1 = arith.constant 1 : index
      %c0_27 = arith.constant 0 : index
      %46 = vector.load %arg5[%c0_25, %c0_26, %c1, %c0_27] : memref<1x1x3x128xf32, #tpu.memory_space<vmem>>, vector<1x1x1x128xf32>
      %47 = vector.shape_cast %46 : vector<1x1x1x128xf32> to vector<1x128xf32>
      %48 = arith.mulf %27, %6 : vector<32x128xf32>
      %cst_28 = arith.constant dense<0.000000e+00> : vector<128xf32>
      %49 = vector.multi_reduction <add>, %48, %cst_28 [0] : vector<32x128xf32> to vector<128xf32>
      %50 = vector.shape_cast %49 : vector<128xf32> to vector<1x128xf32>
      %51 = arith.addf %47, %50 : vector<1x128xf32>
      %c0_29 = arith.constant 0 : index
      %c0_30 = arith.constant 0 : index
      %c1_31 = arith.constant 1 : index
      %c0_32 = arith.constant 0 : index
      %52 = vector.load %arg5[%c0_29, %c0_30, %c1_31, %c0_32] : memref<1x1x3x128xf32, #tpu.memory_space<vmem>>, vector<1x1x1x128xf32>
      %53 = vector.shape_cast %52 : vector<1x1x1x128xf32> to vector<1x128xf32>
      %54 = vector.shape_cast %51 : vector<1x128xf32> to vector<1x1x1x128xf32>
      tpu.vector_store %arg5[%c0_29, %c0_30, %c1_31, %c0_32], %54 {strides = array<i32>} : memref<1x1x3x128xf32, #tpu.memory_space<vmem>>, vector<1x1x1x128xf32>,
      %c0_33 = arith.constant 0 : index
      %c0_34 = arith.constant 0 : index
      %c2 = arith.constant 2 : index
      %c0_35 = arith.constant 0 : index
      %55 = vector.load %arg5[%c0_33, %c0_34, %c2, %c0_35] : memref<1x1x3x128xf32, #tpu.memory_space<vmem>>, vector<1x1x1x128xf32>
      %56 = vector.shape_cast %55 : vector<1x1x1x128xf32> to vector<1x128xf32>
      %57 = arith.addf %27, %6 : vector<32x128xf32>
      %cst_36 = arith.constant dense<0.000000e+00> : vector<128xf32>
      %58 = vector.multi_reduction <add>, %57, %cst_36 [0] : vector<32x128xf32> to vector<128xf32>
      %59 = vector.shape_cast %58 : vector<128xf32> to vector<1x128xf32>
      %60 = arith.addf %56, %59 : vector<1x128xf32>
      %c0_37 = arith.constant 0 : index
      %c0_38 = arith.constant 0 : index
      %c2_39 = arith.constant 2 : index
      %c0_40 = arith.constant 0 : index
      %61 = vector.load %arg5[%c0_37, %c0_38, %c2_39, %c0_40] : memref<1x1x3x128xf32, #tpu.memory_space<vmem>>, vector<1x1x1x128xf32>
      %62 = vector.shape_cast %61 : vector<1x1x1x128xf32> to vector<1x128xf32>
      %63 = vector.shape_cast %60 : vector<1x128xf32> to vector<1x1x1x128xf32>
      tpu.vector_store %arg5[%c0_37, %c0_38, %c2_39, %c0_40], %63 {strides = array<i32>} : memref<1x1x3x128xf32, #tpu.memory_space<vmem>>, vector<1x1x1x128xf32>,
    } else {
    }
    %c4096_i32_14 = arith.constant 4096 : i32
    %35 = arith.cmpi sgt, %31, %c4096_i32_14 : i32
    %36 = arith.extui %35 : i1 to i32
    %c0_i32_15 = arith.constant 0 : i32
    %37 = arith.cmpi ne, %36, %c0_i32_15 : i32
    scf.if %37 {
      %38 = tpu.iota {dimensions = array<i32: 0>} : vector<32x128xi32>
      %39 = tpu.iota {dimensions = array<i32: 1>} : vector<32x128xi32>
      %c128_i32 = arith.constant 128 : i32
      %40 = vector.broadcast %c128_i32 : i32 to vector<32x128xi32>
      %41 = arith.muli %38, %40 : vector<32x128xi32>
      %42 = vector.broadcast %30 : i32 to vector<32x128xi32>
      %43 = arith.addi %42, %41 : vector<32x128xi32>
      %44 = arith.addi %43, %39 : vector<32x128xi32>
      %c4096_i32_16 = arith.constant 4096 : i32
      %45 = vector.broadcast %c4096_i32_16 : i32 to vector<32x128xi32>
      %46 = arith.cmpi slt, %44, %45 : vector<32x128xi32>
      %c0_17 = arith.constant 0 : index
      %c0_18 = arith.constant 0 : index
      %c0_19 = arith.constant 0 : index
      %c0_20 = arith.constant 0 : index
      %47 = vector.load %arg5[%c0_17, %c0_18, %c0_19, %c0_20] : memref<1x1x3x128xf32, #tpu.memory_space<vmem>>, vector<1x1x1x128xf32>
      %48 = vector.shape_cast %47 : vector<1x1x1x128xf32> to vector<1x128xf32>
      %cst_21 = arith.constant 0.000000e+00 : f32
      %49 = vector.broadcast %cst_21 : f32 to vector<32x128xf32>
      %50 = arith.select %46, %19, %49 : vector<32x128xi1>, vector<32x128xf32>
      %cst_22 = arith.constant dense<0.000000e+00> : vector<128xf32>
      %51 = vector.multi_reduction <add>, %50, %cst_22 [0] : vector<32x128xf32> to vector<128xf32>
      %52 = vector.shape_cast %51 : vector<128xf32> to vector<1x128xf32>
      %53 = arith.addf %48, %52 : vector<1x128xf32>
      %c0_23 = arith.constant 0 : index
      %c0_24 = arith.constant 0 : index
      %c0_25 = arith.constant 0 : index
      %c0_26 = arith.constant 0 : index
      %54 = vector.load %arg5[%c0_23, %c0_24, %c0_25, %c0_26] : memref<1x1x3x128xf32, #tpu.memory_space<vmem>>, vector<1x1x1x128xf32>
      %55 = vector.shape_cast %54 : vector<1x1x1x128xf32> to vector<1x128xf32>
      %56 = vector.shape_cast %53 : vector<1x128xf32> to vector<1x1x1x128xf32>
      tpu.vector_store %arg5[%c0_23, %c0_24, %c0_25, %c0_26], %56 {strides = array<i32>} : memref<1x1x3x128xf32, #tpu.memory_space<vmem>>, vector<1x1x1x128xf32>,
      %c0_27 = arith.constant 0 : index
      %c0_28 = arith.constant 0 : index
      %c1 = arith.constant 1 : index
      %c0_29 = arith.constant 0 : index
      %57 = vector.load %arg5[%c0_27, %c0_28, %c1, %c0_29] : memref<1x1x3x128xf32, #tpu.memory_space<vmem>>, vector<1x1x1x128xf32>
      %58 = vector.shape_cast %57 : vector<1x1x1x128xf32> to vector<1x128xf32>
      %59 = arith.mulf %27, %6 : vector<32x128xf32>
      %cst_30 = arith.constant 0.000000e+00 : f32
      %60 = vector.broadcast %cst_30 : f32 to vector<32x128xf32>
      %61 = arith.select %46, %59, %60 : vector<32x128xi1>, vector<32x128xf32>
      %cst_31 = arith.constant dense<0.000000e+00> : vector<128xf32>
      %62 = vector.multi_reduction <add>, %61, %cst_31 [0] : vector<32x128xf32> to vector<128xf32>
      %63 = vector.shape_cast %62 : vector<128xf32> to vector<1x128xf32>
      %64 = arith.addf %58, %63 : vector<1x128xf32>
      %c0_32 = arith.constant 0 : index
      %c0_33 = arith.constant 0 : index
      %c1_34 = arith.constant 1 : index
      %c0_35 = arith.constant 0 : index
      %65 = vector.load %arg5[%c0_32, %c0_33, %c1_34, %c0_35] : memref<1x1x3x128xf32, #tpu.memory_space<vmem>>, vector<1x1x1x128xf32>
      %66 = vector.shape_cast %65 : vector<1x1x1x128xf32> to vector<1x128xf32>
      %67 = vector.shape_cast %64 : vector<1x128xf32> to vector<1x1x1x128xf32>
      tpu.vector_store %arg5[%c0_32, %c0_33, %c1_34, %c0_35], %67 {strides = array<i32>} : memref<1x1x3x128xf32, #tpu.memory_space<vmem>>, vector<1x1x1x128xf32>,
      %c0_36 = arith.constant 0 : index
      %c0_37 = arith.constant 0 : index
      %c2 = arith.constant 2 : index
      %c0_38 = arith.constant 0 : index
      %68 = vector.load %arg5[%c0_36, %c0_37, %c2, %c0_38] : memref<1x1x3x128xf32, #tpu.memory_space<vmem>>, vector<1x1x1x128xf32>
      %69 = vector.shape_cast %68 : vector<1x1x1x128xf32> to vector<1x128xf32>
      %70 = arith.addf %27, %6 : vector<32x128xf32>
      %cst_39 = arith.constant 0.000000e+00 : f32
      %71 = vector.broadcast %cst_39 : f32 to vector<32x128xf32>
      %72 = arith.select %46, %70, %71 : vector<32x128xi1>, vector<32x128xf32>
      %cst_40 = arith.constant dense<0.000000e+00> : vector<128xf32>
      %73 = vector.multi_reduction <add>, %72, %cst_40 [0] : vector<32x128xf32> to vector<128xf32>
      %74 = vector.shape_cast %73 : vector<128xf32> to vector<1x128xf32>
      %75 = arith.addf %69, %74 : vector<1x128xf32>
      %c0_41 = arith.constant 0 : index
      %c0_42 = arith.constant 0 : index
      %c2_43 = arith.constant 2 : index
      %c0_44 = arith.constant 0 : index
      %76 = vector.load %arg5[%c0_41, %c0_42, %c2_43, %c0_44] : memref<1x1x3x128xf32, #tpu.memory_space<vmem>>, vector<1x1x1x128xf32>
      %77 = vector.shape_cast %76 : vector<1x1x1x128xf32> to vector<1x128xf32>
      %78 = vector.shape_cast %75 : vector<1x128xf32> to vector<1x1x1x128xf32>
      tpu.vector_store %arg5[%c0_41, %c0_42, %c2_43, %c0_44], %78 {strides = array<i32>} : memref<1x1x3x128xf32, #tpu.memory_space<vmem>>, vector<1x1x1x128xf32>,
    } else {
    }
    return
  }
  func.func @transform_0(%arg0: i32, %arg1: i32, %arg2: i32) -> (i32, i32, i32) {
    %c1_i32 = arith.constant 1 : i32
    %0 = arith.muli %arg1, %c1_i32 : i32
    %1 = arith.addi %0, %arg2 : i32
    %c0_i32 = arith.constant 0 : i32
    %c0_i32_0 = arith.constant 0 : i32
    return %arg0, %1, %c0_i32 : i32, i32, i32
  }
  func.func @transform_1(%arg0: i32, %arg1: i32, %arg2: i32) -> (i32, i32, i32) {
    %c1_i32 = arith.constant 1 : i32
    %0 = arith.muli %arg1, %c1_i32 : i32
    %1 = arith.addi %0, %arg2 : i32
    %c0_i32 = arith.constant 0 : i32
    %c0_i32_0 = arith.constant 0 : i32
    return %arg0, %1, %c0_i32 : i32, i32, i32
  }
  func.func @transform_2(%arg0: i32, %arg1: i32, %arg2: i32) -> (i32, i32, i32, i32) {
    %c0_i32 = arith.constant 0 : i32
    %c0_i32_0 = arith.constant 0 : i32
    %c0_i32_1 = arith.constant 0 : i32
    return %arg0, %arg1, %c0_i32, %c0_i32_0 : i32, i32, i32, i32
  }
}

</mosaic_0001>

<bundles_post_ra>
// kernel: aiunet_forward_training.1
= control target key start
LH: loop header
LB: loop body
LE: loop exit
PB: predicated region body
PF: predicated region fallthrough
CT: control target
= control target key end

     0   :  { %s680_s9 = smov 0   ;;  %s682_s10 = smov 0   ;;  %s829_s0 = inlined_call_operand.vmem [shape: f32[2,32,128], index: 0, kind: input, shape index: {}]   ;;  %s830_s1 = inlined_call_operand.vmem [shape: f32[2,32,128], index: 1, kind: input, shape index: {}]   ;;  %s831_s2 = inlined_call_operand.vmem [shape: f32[2,1,3,128], index: 2, kind: output, shape index: {}]  }
   0x1   :  { %s684_s11 = smov 0  }
   0x2 LB: > { %s31_s12 = sadd.s32 1, %s658_s10  ;;  %p581_p0 = scmp.ge.s32.totalorder %s662_s11, 1  ;;  %s662_s11 = sphi %s684_s11, %s12_s11   ;;  %s658_s10 = sphi %s682_s10, %s841_s10   ;;  %s654_s9 = sphi %s680_s9, %s840_s9  }
   0x3   : > { %p33_p1 = scmp.ge.s32.totalorder %s31_s12, 2  ;;  %p165_p2 = scmp.lt.s32.totalorder %s662_s11, 3 }
   0x5   : > { %s843_s12 = smov (%p33_p1, %s31_s12), 0  ;;  %p166_p3 = pnand %p581_p0, %p165_p2 }
   0x6   : > { %p206_p4 = scmp.lt.s32.totalorder (!%p166_p3), %s654_s9, 1 }
   0x7   : > { %169 = sbr.rel (%p166_p3) target bundleno = 88 (0x58), region = 28 }
   0xc   : > { %s845_s9 = smov (!%p206_p4, %s654_s9), 1  ;;  %v664_v3 = vmov 0.0  }
   0xd   : > { %s589_s13 = sshll.u32 %s845_s9, 5  ;;  %s586_s14 = sshll.u32 %s845_s9, 2 }
   0xe   : > { %s213_s17 = scalar_lea.vmem %s829_s0, %s589_s13  ;;  %s710_s20 = scalar_lea.vmem %s831_s2, %s586_s14 }
   0xf   : > { %v712_v0 = vld [vmem:[%s213_s17] sm:$0xff]  ;;  %v714_v1 = vld [vmem:[%s213_s17 + $0x8] sm:$0xff]  ;;  %v716_v2 = vld [vmem:[%s213_s17 + $0x10] sm:$0xff]  ;;  %239 = vst [vmem:[%s710_s20] sm:$0x7] %v664_v3  ;;  %s225_s23 = scalar_lea.vmem %s830_s1, %s589_s13 }
  0x10   : > { %v719_v4 = vld [vmem:[%s213_s17 + $0x18] sm:$0xff]  ;;  %v248_v5 = vand.u32 2147483647, %v712_v0  ;;  %v249_v6 = vand.u32 2147483647, %v714_v1  ;;  %v744_v27 = vld [vmem:[%s225_s23] sm:$0xff] }
  0x11   : > { %v250_v7 = vand.u32 2147483647, %v716_v2  ;;  %v251_v8 = vand.u32 2147483647, %v719_v4  ;;  %v747_v29 = vld [vmem:[%s225_s23 + $0x8] sm:$0xff]  ;;  %v749_v30 = vld [vmem:[%s225_s23 + $0x10] sm:$0xff]  ;;  %v312_v37 = vmul.f32 %v744_v27, %v712_v0 }
  0x12   : > { %v252_v9 = vsub.f32 0.0, %v248_v5  ;;  %v253_v10 = vsub.f32 0.0, %v249_v6  ;;  %v752_v33 = vld [vmem:[%s225_s23 + $0x18] sm:$0xff]  ;;  %v308_v36 = vmax.f32 %v712_v0, 0.0  ;;  %v309_v40 = vmax.f32 %v714_v1, 0.0 }
  0x13   : > { %v254_v11 = vsub.f32 0.0, %v250_v7  ;;  %v255_v12 = vsub.f32 0.0, %v251_v8  ;;  %v313_v41 = vmul.f32 %v747_v29, %v714_v1  ;;  %v310_v43 = vmax.f32 %v716_v2, 0.0 }
  0x14   : > { %v256_v13 = vmul.f32 1.442695, %v252_v9  ;;  %v258_v14 = vmul.f32 1.442695, %v253_v10  ;;  %v314_v44 = vmul.f32 %v749_v30, %v716_v2  ;;  %v311_v47 = vmax.f32 %v719_v4, 0.0 }
  0x15   : > { %v260_v15 = vmul.f32 1.442695, %v254_v11  ;;  %v262_v16 = vmul.f32 1.442695, %v255_v12  ;;  %v315_v48 = vmul.f32 %v752_v33, %v719_v4  ;;  %v316_v53 = vsub.f32 %v308_v36, %v312_v37 }
  0x16   : > { %616 = vpow2.f32 %v256_v13  ;;  %v317_v58 = vsub.f32 %v309_v40, %v313_v41  ;;  %v318_v62 = vsub.f32 %v310_v43, %v314_v44  ;;  %vm324_vm4 = vcmp.ge.f32.partialorder %v712_v0, 0.0  ;;  %v363_v8 = vld [vmem:[%s710_s20 + $0x1] sm:$0x1] }
  0x17   : > { %618 = vpow2.f32 %v258_v14  ;;  %v319_v9 = vsub.f32 %v311_v47, %v315_v48  ;;  %vm325_vm5 = vcmp.ge.f32.partialorder %v714_v1, 0.0  ;;  %vm326_vm6 = vcmp.ge.f32.partialorder %v716_v2, 0.0 }
  0x18   : > { %620 = vpow2.f32 %v260_v15  ;;  %vm327_vm7 = vcmp.ge.f32.partialorder %v719_v4, 0.0 }
  0x19   : > { %622 = vpow2.f32 %v262_v16 }
  0x23   : > { %v725_v17 = vpop.eup %616 }
  0x24   : > { %v727_v18 = vpop.eup %618  ;;  %v264_v19 = vadd.f32 1.0, %v725_v17  ;;  %v267_v25 = vmul.f32 -0.5, %v725_v17  ;;  %v270_v34 = vand.u32 2147483647, %v725_v17 }
  0x25   : > { %v730_v20 = vpop.eup %620  ;;  %v273_v21 = vadd.f32 1.0, %v727_v18  ;;  %v276_v26 = vmul.f32 -0.5, %v727_v18  ;;  %v279_v38 = vand.u32 2147483647, %v727_v18 }
  0x26   : > { %v733_v22 = vpop.eup %622  ;;  %624 = vlog2.f32 %v264_v19  ;;  %v282_v23 = vadd.f32 1.0, %v730_v20  ;;  %v285_v28 = vmul.f32 -0.5, %v730_v20  ;;  %v268_v31 = vadd.f32 1.0, %v267_v25 }
  0x27   : > { %626 = vlog2.f32 %v273_v21  ;;  %v291_v24 = vadd.f32 1.0, %v733_v22  ;;  %v294_v32 = vmul.f32 -0.5, %v733_v22  ;;  %v277_v35 = vadd.f32 1.0, %v276_v26 }
  0x28   : > { %628 = vlog2.f32 %v282_v23  ;;  %v286_v39 = vadd.f32 1.0, %v285_v28  ;;  %v288_v42 = vand.u32 2147483647, %v730_v20  ;;  %v269_v45 = vmul.f32 %v725_v17, %v268_v31 }
  0x29   : > { %630 = vlog2.f32 %v291_v24  ;;  %v295_v46 = vadd.f32 1.0, %v294_v32  ;;  %vm770_vm0 = vcmp.lt.f32.partialorder %v270_v34, 0.0004427343  ;;  %v278_v51 = vmul.f32 %v727_v18, %v277_v35 }
  0x2a   : > { %632 = vrcp.f32 %v264_v19  ;;  %v297_v52 = vand.u32 2147483647, %v733_v22  ;;  %vm776_vm1 = vcmp.lt.f32.partialorder %v279_v38, 0.0004427343  ;;  %v287_v57 = vmul.f32 %v730_v20, %v286_v39 }
  0x2b   : > { %634 = vrcp.f32 %v273_v21  ;;  %vm781_vm2 = vcmp.lt.f32.partialorder %v288_v42, 0.0004427343  ;;  %v296_v5 = vmul.f32 %v733_v22, %v295_v46 }
  0x2c   : > { %636 = vrcp.f32 %v282_v23  ;;  %vm790_vm3 = vcmp.lt.f32.partialorder %v297_v52, 0.0004427343 }
  0x2d   : > { %638 = vrcp.f32 %v291_v24 }
  0x33   : > { %v625_v49 = vpop.eup %624 }
  0x34   : > { %v627_v54 = vpop.eup %626  ;;  %v266_v55 = vmul.f32 0.6931472, %v625_v49 }
  0x35   : > { %v629_v59 = vpop.eup %628  ;;  %v275_v60 = vmul.f32 0.6931472, %v627_v54 }
  0x36   : > { %v272_v63 = vsel %vm770_vm0, %v269_v45, %v266_v55  ;;  %v284_v3 = vmul.f32 0.6931472, %v629_v59  ;;  %v631_v6 = vpop.eup %630 }
  0x37   : > { %v281_v7 = vsel %vm776_vm1, %v278_v51, %v275_v60  ;;  %v320_v10 = vadd.f32 %v316_v53, %v272_v63  ;;  %v633_v11 = vpop.eup %632  ;;  %v293_v13 = vmul.f32 0.6931472, %v631_v6 }
  0x38   : > { %v290_v12 = vsel %vm781_vm2, %v287_v57, %v284_v3  ;;  %v321_v14 = vadd.f32 %v317_v58, %v281_v7  ;;  %v635_v15 = vpop.eup %634  ;;  %v328_v19 = vmul.f32 %v633_v11, %v725_v17  ;;  %v351_v57 = vld [vmem:[%s710_s20] sm:$0x1] }
  0x39   : > { %v322_v16 = vadd.f32 %v318_v62, %v290_v12  ;;  %v637_v21 = vpop.eup %636  ;;  %v299_v23 = vsel %vm790_vm3, %v296_v5, %v293_v13  ;;  %v329_v25 = vmul.f32 %v635_v15, %v727_v18 }
  0x3a   : > { %v352_v24 = vadd.f32 %v321_v14, %v320_v10  ;;  %v639_v26 = vpop.eup %638  ;;  %v323_v28 = vadd.f32 %v319_v9, %v299_v23  ;;  %v330_v0 = vmul.f32 %v637_v21, %v730_v20  ;;  %v332_v31 = vsel %vm324_vm4, %v633_v11, %v328_v19  ;;  %v379_v9 = vld [vmem:[%s710_s20 + $0x2] sm:$0x1] }
  0x3b   : > { %v331_v1 = vmul.f32 %v639_v26, %v733_v22  ;;  %v333_v17 = vsel %vm325_vm5, %v635_v15, %v329_v25  ;;  %v336_v34 = vmax.f32 %v332_v31, 0.0001 }
  0x3c   : > { %v353_v32 = vadd.f32 %v352_v24, %v322_v16  ;;  %v334_v35 = vsel %vm326_vm6, %v637_v21, %v330_v0  ;;  %v337_v36 = vmax.f32 %v333_v17, 0.0001 }
  0x3d   : > { %v335_v38 = vsel %vm327_vm7, %v639_v26, %v331_v1  ;;  %v338_v39 = vmax.f32 %v334_v35, 0.0001  ;;  %v340_v2 = vmin.f32 %v336_v34, 0.9999 }
  0x3e   : > { %v354_v37 = vadd.f32 %v353_v32, %v323_v28  ;;  %v339_v40 = vmax.f32 %v335_v38, 0.0001  ;;  %v341_v18 = vmin.f32 %v337_v36, 0.9999 }
  0x3f   : > { %v342_v42 = vmin.f32 %v338_v39, 0.9999  ;;  %v364_v4 = vmul.f32 %v340_v2, %v744_v27  ;;  %v380_v20 = vadd.f32 %v340_v2, %v744_v27 }
  0x40   : > { %v355_v41 = vrot.slane %v354_v37, 4  ;;  %v343_v43 = vmin.f32 %v339_v40, 0.9999  ;;  %v365_v44 = vmul.f32 %v341_v18, %v747_v29  ;;  %v381_v22 = vadd.f32 %v341_v18, %v747_v29 }
  0x41   : > { %v366_v46 = vmul.f32 %v342_v42, %v749_v30  ;;  %v382_v47 = vadd.f32 %v342_v42, %v749_v30 }
  0x42   : > { %v356_v45 = vadd.f32 %v355_v41, %v354_v37  ;;  %v367_v48 = vmul.f32 %v343_v43, %v752_v33  ;;  %v368_v49 = vadd.f32 %v365_v44, %v364_v4  ;;  %v383_v50 = vadd.f32 %v343_v43, %v752_v33 }
  0x43   : > { %v384_v51 = vadd.f32 %v381_v22, %v380_v20 }
  0x44   : > { %v357_v52 = vrot.slane %v356_v45, 2  ;;  %v369_v27 = vadd.f32 %v368_v49, %v366_v46 }
  0x45   : > { %v385_v53 = vadd.f32 %v384_v51, %v382_v47 }
  0x46   : > { %v358_v54 = vadd.f32 %v357_v52, %v356_v45  ;;  %v370_v55 = vadd.f32 %v369_v27, %v367_v48 }
  0x47   : > { %v386_v56 = vadd.f32 %v385_v53, %v383_v50 }
  0x48   : > { %v359_v29 = vrot.slane %v358_v54, 1  ;;  %v371_v58 = vrot.slane %v370_v55, 4 }
  0x49   : > { %v387_v59 = vrot.slane %v386_v56, 4 }
  0x4a   : > { %v360_v30 = vadd.f32 %v359_v29, %v358_v54  ;;  %v372_v60 = vadd.f32 %v371_v58, %v370_v55 }
  0x4b   : > { %v388_v61 = vadd.f32 %v387_v59, %v386_v56 }
  0x4c   : > { %v361_v33 = vadd.f32 %v360_v30, %v351_v57  ;;  %v373_v62 = vrot.slane %v372_v60, 2 }
  0x4d   : > { %v389_v63 = vrot.slane %v388_v61, 2 }
  0x4e   : > { %362 = vst [vmem:[%s710_s20] sm:$0x1] %v361_v33  ;;  %v374_v3 = vadd.f32 %v373_v62, %v372_v60 }
  0x4f   : > { %v390_v5 = vadd.f32 %v389_v63, %v388_v61 }
  0x50   : > { %v375_v6 = vrot.slane %v374_v3, 1 }
  0x51   : > { %v391_v7 = vrot.slane %v390_v5, 1 }
  0x52   : > { %v376_v10 = vadd.f32 %v375_v6, %v374_v3 }
  0x53   : > { %v392_v11 = vadd.f32 %v391_v7, %v390_v5 }
  0x54   : > { %v377_v12 = vadd.f32 %v376_v10, %v363_v8 }
  0x55   : > { %v393_v13 = vadd.f32 %v392_v11, %v379_v9 }
  0x56   : > { %378 = vst [vmem:[%s710_s20 + $0x1] sm:$0x1] %v377_v12 }
  0x57   : > { %394 = vst [vmem:[%s710_s20 + $0x2] sm:$0x1] %v393_v13 }
  0x58 PF: > { %s12_s11 = sadd.s32 1, %s662_s11   ;;  %s840_s9 = smov %s658_s10 }
  0x59   : > { %p9_p5 = scmp.ge.s32.totalorder %s12_s11, 4   ;;  %s841_s10 = smov %s843_s12 }
  0x5b   :  { %11 = sbr.rel (!%p9_p5) target bundleno = 2 (0x2), region = 73 }

</bundles_post_ra>
